<compile_context>
chip_gen: v5e
topology: v5e:2x2
jax: 0.10.0
libtpu: 0.0.40
codegen_flags: <defaults>
</compile_context>

<pallas_src>
import jax
import jax.numpy as jnp
from jax import lax
from jax.experimental import pallas as pl
from jax.experimental.pallas import tpu as pltpu

# ---------------- config (small, consistent with the module) ----------------
LATENT_STATE_SIZE = 48          # stochastic + recurrent size
DENSE_UNITS = 64                # dense_units (small stand-in for 400)
MLP_LAYERS = 4                  # default
ACTIONS_DIM = (12, 16, 8)       # >= 3 discrete heads (MineDojo-style)
A_TOTAL = sum(ACTIONS_DIM)

_LANE = 128
DENSE_PAD = ((DENSE_UNITS + _LANE - 1) // _LANE) * _LANE    # 128
A_PAD = ((A_TOTAL + _LANE - 1) // _LANE) * _LANE            # 128


def _round_up(x, m):
    return (x + m - 1) // m * m


# ------------------------------- kernel -------------------------------------
def _elu(x):
    # clamp before exp to avoid inf on large positives (result is discarded anyway)
    return jnp.where(x > 0.0, x, jnp.exp(jnp.minimum(x, 0.0)) - 1.0)


def _uniform_from_hash(seed, row, col):
    """Counter-based integer hash -> uniform in (0,1).  jnp/lax ops only."""
    x = row * jnp.int32(1000003) + col * jnp.int32(69069) + seed
    for _ in range(2):
        x = x ^ lax.shift_right_logical(x, jnp.int32(16))
        x = x * jnp.int32(0x45D9F3B)
    x = x ^ lax.shift_right_logical(x, jnp.int32(16))
    u = jnp.bitwise_and(x, jnp.int32(0x7FFFFF)).astype(jnp.float32) * (1.0 / (1 << 23))
    return jnp.clip(u, 1e-7, 1.0 - 1e-7)


def _make_kernel(actions_dim, n_layers, sample, tm):
    def kernel(seed_ref, state_ref, *rest):
        mlp_refs = rest[: 2 * n_layers]
        wh_ref = rest[2 * n_layers]
        bh_ref = rest[2 * n_layers + 1]
        logits_ref = rest[2 * n_layers + 2]
        actions_ref = rest[2 * n_layers + 3]

        # MLP trunk: (Linear + ELU) x n_layers (layer_norm=False default).
        # bf16 operands into the MXU, f32 accumulation, f32 elementwise math.
        x = state_ref[...]                                        # (TM, LATENT) f32
        for i in range(n_layers):
            w = mlp_refs[2 * i][...]                              # bf16 (in_pad, DENSE_PAD)
            b = mlp_refs[2 * i + 1][...]                          # f32  (1, DENSE_PAD)
            x = jnp.dot(x.astype(jnp.bfloat16), w,
                        preferred_element_type=jnp.float32) + b
            x = _elu(x)

        # All heads fused into one lane-dense matmul (columns concatenated, padded to 128).
        logits = jnp.dot(x.astype(jnp.bfloat16), wh_ref[...],
                         preferred_element_type=jnp.float32) + bh_ref[...]
        logits_ref[...] = logits

        col = lax.broadcasted_iota(jnp.int32, logits.shape, 1)    # hoisted, reused below
        if sample:
            # Gumbel-max categorical sampling == OneHotCategorical.rsample forward value.
            # Noise keyed on (seed, global row, column) so every row tile draws
            # independent noise regardless of tiling.
            row = lax.broadcasted_iota(jnp.int32, logits.shape, 0) + pl.program_id(0) * tm
            u = _uniform_from_hash(seed_ref[0], row, col)
            score = logits + (-jnp.log(-jnp.log(u)))
        else:
            score = logits

        # Per-head one-hot of first argmax, fused into one full-width pass and a
        # SINGLE lane-dense store (no masked sub-lane slice stores).
        onehot = jnp.zeros(score.shape, jnp.float32)
        off = 0
        for a in actions_dim:
            seg = jnp.logical_and(col >= off, col < off + a)
            s = jnp.where(seg, score, jnp.float32(-1e30))
            m = jnp.max(s, axis=-1, keepdims=True)
            first = jnp.min(jnp.where(jnp.logical_and(seg, s == m), col, logits.shape[-1]),
                            axis=-1, keepdims=True)
            onehot = onehot + (col == first).astype(jnp.float32)
            off += a
        actions_ref[...] = onehot

    return kernel


# --------------------------- parameter handling ------------------------------
def init_params(key):
    """PyTorch nn.Linear default init, weights stored as (in, out), f32."""
    mlp_ws, mlp_bs = [], []
    in_dim = LATENT_STATE_SIZE
    for _ in range(MLP_LAYERS):
        key, kw, kb = jax.random.split(key, 3)
        bound = 1.0 / jnp.sqrt(in_dim)
        mlp_ws.append(jax.random.uniform(kw, (in_dim, DENSE_UNITS), jnp.float32, -bound, bound))
        mlp_bs.append(jax.random.uniform(kb, (1, DENSE_UNITS), jnp.float32, -bound, bound))
        in_dim = DENSE_UNITS
    head_ws, head_bs = [], []
    for a in ACTIONS_DIM:
        key, kw, kb = jax.random.split(key, 3)
        bound = 1.0 / jnp.sqrt(DENSE_UNITS)
        head_ws.append(jax.random.uniform(kw, (DENSE_UNITS, a), jnp.float32, -bound, bound))
        head_bs.append(jax.random.uniform(kb, (1, a), jnp.float32, -bound, bound))
    return mlp_ws, mlp_bs, head_ws, head_bs


def prepare_params(params):
    """One-time prep: pad hidden/head widths to 128 lanes, concat heads, cast weights bf16."""
    mlp_ws, mlp_bs, head_ws, head_bs = params
    p_ws, p_bs = [], []
    for i, (w, b) in enumerate(zip(mlp_ws, mlp_bs)):
        in_dim = w.shape[0]
        in_pad = in_dim if i == 0 else DENSE_PAD
        wp = jnp.zeros((in_pad, DENSE_PAD), jnp.float32).at[:in_dim, :w.shape[1]].set(w)
        bp = jnp.zeros((1, DENSE_PAD), jnp.float32).at[:, :b.shape[1]].set(b)
        p_ws.append(wp.astype(jnp.bfloat16))
        p_bs.append(bp)
    wh = jnp.concatenate(head_ws, axis=1)                       # (DENSE, A_TOTAL)
    bh = jnp.concatenate(head_bs, axis=1)                       # (1, A_TOTAL)
    whp = (jnp.zeros((DENSE_PAD, A_PAD), jnp.float32)
           .at[:wh.shape[0], :A_TOTAL].set(wh).astype(jnp.bfloat16))
    bhp = jnp.zeros((1, A_PAD), jnp.float32).at[:, :A_TOTAL].set(bh)
    return p_ws, p_bs, whp, bhp


# ------------------------------- wrapper --------------------------------------
def minedojo_actor_forward(state, prepared, *, is_training=True, seed=0):
    """state: (T, B, latent) or (N, latent). Returns (actions_tuple, logits_tuple)."""
    lead_shape = state.shape[:-1]
    x = state.reshape(-1, state.shape[-1]).astype(jnp.float32)
    n = x.shape[0]

    tm = min(512, _round_up(max(n, 1), 8))      # row tile (multiple of 8 for f32)
    n_pad = _round_up(n, tm)
    if n_pad != n:
        x = jnp.pad(x, ((0, n_pad - n), (0, 0)))
    grid = n_pad // tm

    mlp_ws, mlp_bs, wh, bh = prepared
    flat = [x]
    for w, b in zip(mlp_ws, mlp_bs):
        flat += [w, b]
    flat += [wh, bh]

    row_map = lambda i, s: (i, 0)
    const_map = lambda i, s: (0, 0)             # weights/biases resident across the grid
    in_specs = [pl.BlockSpec((tm, x.shape[1]), row_map)]
    in_specs += [pl.BlockSpec(a.shape, const_map) for a in flat[1:]]

    kernel = _make_kernel(ACTIONS_DIM, MLP_LAYERS, bool(is_training), tm)

    logits, actions = pl.pallas_call(
        kernel,
        out_shape=(
            jax.ShapeDtypeStruct((n_pad, A_PAD), jnp.float32),
            jax.ShapeDtypeStruct((n_pad, A_PAD), jnp.float32),
        ),
        grid_spec=pltpu.PrefetchScalarGridSpec(
            num_scalar_prefetch=1,
            grid=(grid,),
            in_specs=in_specs,
            out_specs=(
                pl.BlockSpec((tm, A_PAD), row_map),
                pl.BlockSpec((tm, A_PAD), row_map),
            ),
        ),
        compiler_params=pltpu.CompilerParams(
            dimension_semantics=("parallel",),
            vmem_limit_bytes=32 * 1024 * 1024,
        ),
    )(jnp.array([seed], jnp.int32), *flat)

    # Slice off row/lane padding, split fused columns per head, restore leading dims.
    actions_out, logits_out = [], []
    off = 0
    for a in ACTIONS_DIM:
        actions_out.append(actions[:n, off:off + a].reshape(*lead_shape, a))
        logits_out.append(logits[:n, off:off + a].reshape(*lead_shape, a))
        off += a
    # TODO(synk): torch.distributions objects (and the straight-through gradient of
    # rsample) have no Pallas equivalent; distributions are returned as their logits.
    # TODO(synk): the MineDojo action-mask branch (mask != None, data-dependent Python
    # loops over t,b) is not translated; this implements the mask=None path.
    return tuple(actions_out), tuple(logits_out)


# ------------------------- pure-JAX reference (f32) ---------------------------
def ref_logits(state, params):
    mlp_ws, mlp_bs, head_ws, head_bs = params
    x = state.reshape(-1, state.shape[-1]).astype(jnp.float32)
    for w, b in zip(mlp_ws, mlp_bs):
        x = x @ w + b
        x = jnp.where(x > 0.0, x, jnp.exp(jnp.minimum(x, 0.0)) - 1.0)
    return [x @ wh + bh for wh, bh in zip(head_ws, head_bs)]


# --------------------------------- main ---------------------------------------
if __name__ == "__main__":
    key = jax.random.PRNGKey(0)
    key, pkey, skey = jax.random.split(key, 3)
    params = init_params(pkey)
    prepared = prepare_params(params)   # one-time padding / concat / bf16 cast

    T, B = 2, 4  # state: (seq, batch, latent_state_size)
    state = jax.random.normal(skey, (T, B, LATENT_STATE_SIZE), jnp.float32)

    # Inference path (is_training=False -> dist.mode).
    actions_mode, logits_mode = minedojo_actor_forward(state, prepared, is_training=False)
    jax.block_until_ready(actions_mode)

    rlogits = ref_logits(state, params)
    for a, l, rl, ad in zip(actions_mode, logits_mode, rlogits, ACTIONS_DIM):
        assert a.shape == (T, B, ad) and l.shape == (T, B, ad)
        lf = l.reshape(-1, ad)
        af = a.reshape(-1, ad)
        # bf16 matmuls -> loose tolerance vs the f32 reference
        assert jnp.allclose(lf, rl, atol=3e-2, rtol=3e-2), "logits mismatch"
        # mode == one-hot of first argmax of the kernel's own logits (exact)
        idx = jnp.argmax(lf, axis=-1)
        assert jnp.array_equal(af, jax.nn.one_hot(idx, ad, dtype=jnp.float32))

    # Training path (is_training=True -> rsample forward value via Gumbel-max).
    actions_tr, logits_tr = minedojo_actor_forward(state, prepared, is_training=True, seed=1234)
    jax.block_until_ready(actions_tr)
    for a, l, lm in zip(actions_tr, logits_tr, logits_mode):
        assert jnp.allclose(a.sum(-1), 1.0)                         # valid one-hot samples
        assert jnp.all(jnp.logical_or(a == 0.0, a == 1.0))
        assert jnp.allclose(l, lm)                                  # sampling leaves logits unchanged

    print("KERNEL_OK")
</pallas_src>

<mosaic_0001>
module attributes {stable_mosaic.version = 11 : i64} {
  func.func @kernel(%arg0: i32, %arg1: memref<1xi32, #tpu.memory_space<smem>>, %arg2: memref<8x48xf32, #tpu.memory_space<vmem>>, %arg3: memref<48x128xbf16, #tpu.memory_space<vmem>>, %arg4: memref<1x128xf32, #tpu.memory_space<vmem>>, %arg5: memref<128x128xbf16, #tpu.memory_space<vmem>>, %arg6: memref<1x128xf32, #tpu.memory_space<vmem>>, %arg7: memref<128x128xbf16, #tpu.memory_space<vmem>>, %arg8: memref<1x128xf32, #tpu.memory_space<vmem>>, %arg9: memref<128x128xbf16, #tpu.memory_space<vmem>>, %arg10: memref<1x128xf32, #tpu.memory_space<vmem>>, %arg11: memref<128x128xbf16, #tpu.memory_space<vmem>>, %arg12: memref<1x128xf32, #tpu.memory_space<vmem>>, %arg13: memref<8x128xf32, #tpu.memory_space<vmem>>, %arg14: memref<8x128xf32, #tpu.memory_space<vmem>>) attributes {dimension_semantics = [#tpu.dimension_semantics<parallel>], iteration_bounds = array<i64: 1>, scalar_prefetch = 1 : i64, scratch_operands = 0 : i64, tpu.core_type = #tpu.core_type<tc>, window_params = [{transform_indices = @transform_0, window_bounds = array<i64: 8, 48>}, {pipeline_mode = #tpu.pipeline_mode<synchronous>, transform_indices = @transform_1, window_bounds = array<i64: 48, 128>}, {pipeline_mode = #tpu.pipeline_mode<synchronous>, transform_indices = @transform_2, window_bounds = array<i64: 1, 128>}, {pipeline_mode = #tpu.pipeline_mode<synchronous>, transform_indices = @transform_3, window_bounds = array<i64: 128, 128>}, {pipeline_mode = #tpu.pipeline_mode<synchronous>, transform_indices = @transform_4, window_bounds = array<i64: 1, 128>}, {pipeline_mode = #tpu.pipeline_mode<synchronous>, transform_indices = @transform_5, window_bounds = array<i64: 128, 128>}, {pipeline_mode = #tpu.pipeline_mode<synchronous>, transform_indices = @transform_6, window_bounds = array<i64: 1, 128>}, {pipeline_mode = #tpu.pipeline_mode<synchronous>, transform_indices = @transform_7, window_bounds = array<i64: 128, 128>}, {pipeline_mode = #tpu.pipeline_mode<synchronous>, transform_indices = @transform_8, window_bounds = array<i64: 1, 128>}, {pipeline_mode = #tpu.pipeline_mode<synchronous>, transform_indices = @transform_9, window_bounds = array<i64: 128, 128>}, {pipeline_mode = #tpu.pipeline_mode<synchronous>, transform_indices = @transform_10, window_bounds = array<i64: 1, 128>}, {transform_indices = @transform_11, window_bounds = array<i64: 8, 128>}, {transform_indices = @transform_12, window_bounds = array<i64: 8, 128>}]} {
    %c0 = arith.constant 0 : index
    %c0_0 = arith.constant 0 : index
    %0 = vector.load %arg2[%c0, %c0_0] : memref<8x48xf32, #tpu.memory_space<vmem>>, vector<8x48xf32>
    %c0_1 = arith.constant 0 : index
    %c0_2 = arith.constant 0 : index
    %1 = vector.load %arg3[%c0_1, %c0_2] : memref<48x128xbf16, #tpu.memory_space<vmem>>, vector<48x128xbf16>
    %c0_3 = arith.constant 0 : index
    %c0_4 = arith.constant 0 : index
    %2 = vector.load %arg4[%c0_3, %c0_4] : memref<1x128xf32, #tpu.memory_space<vmem>>, vector<1x128xf32>
    %3 = arith.truncf %0 : vector<8x48xf32> to vector<8x48xbf16>
    %cst = arith.constant dense<0.000000e+00> : vector<8x128xf32>
    %4 = tpu.matmul %3, %1, %cst {dimension_numbers = #tpu.dot_dimension_numbers<[1], [0], [0], [1], [0, 0, 1, 1], [], []>} : vector<8x48xbf16>, vector<48x128xbf16>, vector<8x128xf32> -> vector<8x128xf32>
    %5 = vector.broadcast %2 : vector<1x128xf32> to vector<8x128xf32>
    %6 = arith.addf %4, %5 : vector<8x128xf32>
    %cst_5 = arith.constant 0.000000e+00 : f32
    %7 = vector.broadcast %cst_5 : f32 to vector<8x128xf32>
    %8 = arith.cmpf ogt, %6, %7 : vector<8x128xf32>
    %cst_6 = arith.constant 0.000000e+00 : f32
    %9 = vector.broadcast %cst_6 : f32 to vector<8x128xf32>
    %10 = arith.minimumf %6, %9 : vector<8x128xf32>
    %11 = math.exp %10 : vector<8x128xf32>
    %cst_7 = arith.constant 1.000000e+00 : f32
    %12 = vector.broadcast %cst_7 : f32 to vector<8x128xf32>
    %13 = arith.subf %11, %12 : vector<8x128xf32>
    %14 = arith.select %8, %6, %13 : vector<8x128xi1>, vector<8x128xf32>
    %c0_8 = arith.constant 0 : index
    %c0_9 = arith.constant 0 : index
    %15 = vector.load %arg5[%c0_8, %c0_9] : memref<128x128xbf16, #tpu.memory_space<vmem>>, vector<128x128xbf16>
    %c0_10 = arith.constant 0 : index
    %c0_11 = arith.constant 0 : index
    %16 = vector.load %arg6[%c0_10, %c0_11] : memref<1x128xf32, #tpu.memory_space<vmem>>, vector<1x128xf32>
    %17 = arith.truncf %14 : vector<8x128xf32> to vector<8x128xbf16>
    %cst_12 = arith.constant dense<0.000000e+00> : vector<8x128xf32>
    %18 = tpu.matmul %17, %15, %cst_12 {dimension_numbers = #tpu.dot_dimension_numbers<[1], [0], [0], [1], [0, 0, 1, 1], [], []>} : vector<8x128xbf16>, vector<128x128xbf16>, vector<8x128xf32> -> vector<8x128xf32>
    %19 = vector.broadcast %16 : vector<1x128xf32> to vector<8x128xf32>
    %20 = arith.addf %18, %19 : vector<8x128xf32>
    %cst_13 = arith.constant 0.000000e+00 : f32
    %21 = vector.broadcast %cst_13 : f32 to vector<8x128xf32>
    %22 = arith.cmpf ogt, %20, %21 : vector<8x128xf32>
    %cst_14 = arith.constant 0.000000e+00 : f32
    %23 = vector.broadcast %cst_14 : f32 to vector<8x128xf32>
    %24 = arith.minimumf %20, %23 : vector<8x128xf32>
    %25 = math.exp %24 : vector<8x128xf32>
    %cst_15 = arith.constant 1.000000e+00 : f32
    %26 = vector.broadcast %cst_15 : f32 to vector<8x128xf32>
    %27 = arith.subf %25, %26 : vector<8x128xf32>
    %28 = arith.select %22, %20, %27 : vector<8x128xi1>, vector<8x128xf32>
    %c0_16 = arith.constant 0 : index
    %c0_17 = arith.constant 0 : index
    %29 = vector.load %arg7[%c0_16, %c0_17] : memref<128x128xbf16, #tpu.memory_space<vmem>>, vector<128x128xbf16>
    %c0_18 = arith.constant 0 : index
    %c0_19 = arith.constant 0 : index
    %30 = vector.load %arg8[%c0_18, %c0_19] : memref<1x128xf32, #tpu.memory_space<vmem>>, vector<1x128xf32>
    %31 = arith.truncf %28 : vector<8x128xf32> to vector<8x128xbf16>
    %cst_20 = arith.constant dense<0.000000e+00> : vector<8x128xf32>
    %32 = tpu.matmul %31, %29, %cst_20 {dimension_numbers = #tpu.dot_dimension_numbers<[1], [0], [0], [1], [0, 0, 1, 1], [], []>} : vector<8x128xbf16>, vector<128x128xbf16>, vector<8x128xf32> -> vector<8x128xf32>
    %33 = vector.broadcast %30 : vector<1x128xf32> to vector<8x128xf32>
    %34 = arith.addf %32, %33 : vector<8x128xf32>
    %cst_21 = arith.constant 0.000000e+00 : f32
    %35 = vector.broadcast %cst_21 : f32 to vector<8x128xf32>
    %36 = arith.cmpf ogt, %34, %35 : vector<8x128xf32>
    %cst_22 = arith.constant 0.000000e+00 : f32
    %37 = vector.broadcast %cst_22 : f32 to vector<8x128xf32>
    %38 = arith.minimumf %34, %37 : vector<8x128xf32>
    %39 = math.exp %38 : vector<8x128xf32>
    %cst_23 = arith.constant 1.000000e+00 : f32
    %40 = vector.broadcast %cst_23 : f32 to vector<8x128xf32>
    %41 = arith.subf %39, %40 : vector<8x128xf32>
    %42 = arith.select %36, %34, %41 : vector<8x128xi1>, vector<8x128xf32>
    %c0_24 = arith.constant 0 : index
    %c0_25 = arith.constant 0 : index
    %43 = vector.load %arg9[%c0_24, %c0_25] : memref<128x128xbf16, #tpu.memory_space<vmem>>, vector<128x128xbf16>
    %c0_26 = arith.constant 0 : index
    %c0_27 = arith.constant 0 : index
    %44 = vector.load %arg10[%c0_26, %c0_27] : memref<1x128xf32, #tpu.memory_space<vmem>>, vector<1x128xf32>
    %45 = arith.truncf %42 : vector<8x128xf32> to vector<8x128xbf16>
    %cst_28 = arith.constant dense<0.000000e+00> : vector<8x128xf32>
    %46 = tpu.matmul %45, %43, %cst_28 {dimension_numbers = #tpu.dot_dimension_numbers<[1], [0], [0], [1], [0, 0, 1, 1], [], []>} : vector<8x128xbf16>, vector<128x128xbf16>, vector<8x128xf32> -> vector<8x128xf32>
    %47 = vector.broadcast %44 : vector<1x128xf32> to vector<8x128xf32>
    %48 = arith.addf %46, %47 : vector<8x128xf32>
    %cst_29 = arith.constant 0.000000e+00 : f32
    %49 = vector.broadcast %cst_29 : f32 to vector<8x128xf32>
    %50 = arith.cmpf ogt, %48, %49 : vector<8x128xf32>
    %cst_30 = arith.constant 0.000000e+00 : f32
    %51 = vector.broadcast %cst_30 : f32 to vector<8x128xf32>
    %52 = arith.minimumf %48, %51 : vector<8x128xf32>
    %53 = math.exp %52 : vector<8x128xf32>
    %cst_31 = arith.constant 1.000000e+00 : f32
    %54 = vector.broadcast %cst_31 : f32 to vector<8x128xf32>
    %55 = arith.subf %53, %54 : vector<8x128xf32>
    %56 = arith.select %50, %48, %55 : vector<8x128xi1>, vector<8x128xf32>
    %57 = arith.truncf %56 : vector<8x128xf32> to vector<8x128xbf16>
    %c0_32 = arith.constant 0 : index
    %c0_33 = arith.constant 0 : index
    %58 = vector.load %arg11[%c0_32, %c0_33] : memref<128x128xbf16, #tpu.memory_space<vmem>>, vector<128x128xbf16>
    %cst_34 = arith.constant dense<0.000000e+00> : vector<8x128xf32>
    %59 = tpu.matmul %57, %58, %cst_34 {dimension_numbers = #tpu.dot_dimension_numbers<[1], [0], [0], [1], [0, 0, 1, 1], [], []>} : vector<8x128xbf16>, vector<128x128xbf16>, vector<8x128xf32> -> vector<8x128xf32>
    %c0_35 = arith.constant 0 : index
    %c0_36 = arith.constant 0 : index
    %60 = vector.load %arg12[%c0_35, %c0_36] : memref<1x128xf32, #tpu.memory_space<vmem>>, vector<1x128xf32>
    %61 = vector.broadcast %60 : vector<1x128xf32> to vector<8x128xf32>
    %62 = arith.addf %59, %61 : vector<8x128xf32>
    %c0_37 = arith.constant 0 : index
    %c0_38 = arith.constant 0 : index
    %63 = vector.load %arg13[%c0_37, %c0_38] : memref<8x128xf32, #tpu.memory_space<vmem>>, vector<8x128xf32>
    tpu.vector_store %arg13[%c0_37, %c0_38], %62 {strides = array<i32>} : memref<8x128xf32, #tpu.memory_space<vmem>>, vector<8x128xf32>,
    %64 = tpu.iota {dimensions = array<i32: 1>} : vector<8x128xi32>
    %cst_39 = arith.constant 0.000000e+00 : f32
    %65 = vector.broadcast %cst_39 : f32 to vector<8x128xf32>
    %c0_i32 = arith.constant 0 : i32
    %66 = vector.broadcast %c0_i32 : i32 to vector<8x128xi32>
    %67 = arith.cmpi sge, %64, %66 : vector<8x128xi32>
    %c12_i32 = arith.constant 12 : i32
    %68 = vector.broadcast %c12_i32 : i32 to vector<8x128xi32>
    %69 = arith.cmpi slt, %64, %68 : vector<8x128xi32>
    %70 = arith.andi %67, %69 : vector<8x128xi1>
    %cst_40 = arith.constant -1.000000e+30 : f32
    %71 = vector.broadcast %cst_40 : f32 to vector<8x128xf32>
    %72 = arith.select %70, %62, %71 : vector<8x128xi1>, vector<8x128xf32>
    %cst_41 = arith.constant dense<0xFF800000> : vector<8xf32>
    %73 = vector.multi_reduction <maximumf>, %72, %cst_41 [1] : vector<8x128xf32> to vector<8xf32>
    %74 = vector.shape_cast %73 : vector<8xf32> to vector<8x1xf32>
    %75 = vector.broadcast %74 : vector<8x1xf32> to vector<8x128xf32>
    %76 = arith.cmpf oeq, %72, %75 : vector<8x128xf32>
    %77 = arith.andi %70, %76 : vector<8x128xi1>
    %c128_i32 = arith.constant 128 : i32
    %78 = vector.broadcast %c128_i32 : i32 to vector<8x128xi32>
    %79 = arith.select %77, %64, %78 : vector<8x128xi1>, vector<8x128xi32>
    %cst_42 = arith.constant dense<2147483647> : vector<8xi32>
    %80 = vector.multi_reduction <minsi>, %79, %cst_42 [1] : vector<8x128xi32> to vector<8xi32>
    %81 = vector.shape_cast %80 : vector<8xi32> to vector<8x1xi32>
    %82 = vector.broadcast %81 : vector<8x1xi32> to vector<8x128xi32>
    %83 = arith.cmpi eq, %64, %82 : vector<8x128xi32>
    %84 = arith.extui %83 : vector<8x128xi1> to vector<8x128xi32>
    %85 = arith.sitofp %84 : vector<8x128xi32> to vector<8x128xf32>
    %86 = arith.addf %65, %85 : vector<8x128xf32>
    %c12_i32_43 = arith.constant 12 : i32
    %87 = vector.broadcast %c12_i32_43 : i32 to vector<8x128xi32>
    %88 = arith.cmpi sge, %64, %87 : vector<8x128xi32>
    %c28_i32 = arith.constant 28 : i32
    %89 = vector.broadcast %c28_i32 : i32 to vector<8x128xi32>
    %90 = arith.cmpi slt, %64, %89 : vector<8x128xi32>
    %91 = arith.andi %88, %90 : vector<8x128xi1>
    %cst_44 = arith.constant -1.000000e+30 : f32
    %92 = vector.broadcast %cst_44 : f32 to vector<8x128xf32>
    %93 = arith.select %91, %62, %92 : vector<8x128xi1>, vector<8x128xf32>
    %cst_45 = arith.constant dense<0xFF800000> : vector<8xf32>
    %94 = vector.multi_reduction <maximumf>, %93, %cst_45 [1] : vector<8x128xf32> to vector<8xf32>
    %95 = vector.shape_cast %94 : vector<8xf32> to vector<8x1xf32>
    %96 = vector.broadcast %95 : vector<8x1xf32> to vector<8x128xf32>
    %97 = arith.cmpf oeq, %93, %96 : vector<8x128xf32>
    %98 = arith.andi %91, %97 : vector<8x128xi1>
    %c128_i32_46 = arith.constant 128 : i32
    %99 = vector.broadcast %c128_i32_46 : i32 to vector<8x128xi32>
    %100 = arith.select %98, %64, %99 : vector<8x128xi1>, vector<8x128xi32>
    %cst_47 = arith.constant dense<2147483647> : vector<8xi32>
    %101 = vector.multi_reduction <minsi>, %100, %cst_47 [1] : vector<8x128xi32> to vector<8xi32>
    %102 = vector.shape_cast %101 : vector<8xi32> to vector<8x1xi32>
    %103 = vector.broadcast %102 : vector<8x1xi32> to vector<8x128xi32>
    %104 = arith.cmpi eq, %64, %103 : vector<8x128xi32>
    %105 = arith.extui %104 : vector<8x128xi1> to vector<8x128xi32>
    %106 = arith.sitofp %105 : vector<8x128xi32> to vector<8x128xf32>
    %107 = arith.addf %86, %106 : vector<8x128xf32>
    %c28_i32_48 = arith.constant 28 : i32
    %108 = vector.broadcast %c28_i32_48 : i32 to vector<8x128xi32>
    %109 = arith.cmpi sge, %64, %108 : vector<8x128xi32>
    %c36_i32 = arith.constant 36 : i32
    %110 = vector.broadcast %c36_i32 : i32 to vector<8x128xi32>
    %111 = arith.cmpi slt, %64, %110 : vector<8x128xi32>
    %112 = arith.andi %109, %111 : vector<8x128xi1>
    %cst_49 = arith.constant -1.000000e+30 : f32
    %113 = vector.broadcast %cst_49 : f32 to vector<8x128xf32>
    %114 = arith.select %112, %62, %113 : vector<8x128xi1>, vector<8x128xf32>
    %cst_50 = arith.constant dense<0xFF800000> : vector<8xf32>
    %115 = vector.multi_reduction <maximumf>, %114, %cst_50 [1] : vector<8x128xf32> to vector<8xf32>
    %116 = vector.shape_cast %115 : vector<8xf32> to vector<8x1xf32>
    %117 = vector.broadcast %116 : vector<8x1xf32> to vector<8x128xf32>
    %118 = arith.cmpf oeq, %114, %117 : vector<8x128xf32>
    %119 = arith.andi %112, %118 : vector<8x128xi1>
    %c128_i32_51 = arith.constant 128 : i32
    %120 = vector.broadcast %c128_i32_51 : i32 to vector<8x128xi32>
    %121 = arith.select %119, %64, %120 : vector<8x128xi1>, vector<8x128xi32>
    %cst_52 = arith.constant dense<2147483647> : vector<8xi32>
    %122 = vector.multi_reduction <minsi>, %121, %cst_52 [1] : vector<8x128xi32> to vector<8xi32>
    %123 = vector.shape_cast %122 : vector<8xi32> to vector<8x1xi32>
    %124 = vector.broadcast %123 : vector<8x1xi32> to vector<8x128xi32>
    %125 = arith.cmpi eq, %64, %124 : vector<8x128xi32>
    %126 = arith.extui %125 : vector<8x128xi1> to vector<8x128xi32>
    %127 = arith.sitofp %126 : vector<8x128xi32> to vector<8x128xf32>
    %128 = arith.addf %107, %127 : vector<8x128xf32>
    %c0_53 = arith.constant 0 : index
    %c0_54 = arith.constant 0 : index
    %129 = vector.load %arg14[%c0_53, %c0_54] : memref<8x128xf32, #tpu.memory_space<vmem>>, vector<8x128xf32>
    tpu.vector_store %arg14[%c0_53, %c0_54], %128 {strides = array<i32>} : memref<8x128xf32, #tpu.memory_space<vmem>>, vector<8x128xf32>,
    return
  }
  func.func @transform_0(%arg0: i32, %arg1: memref<1xi32, #tpu.memory_space<smem>>) -> (i32, i32) {
    %c0_i32 = arith.constant 0 : i32
    %c0_i32_0 = arith.constant 0 : i32
    return %arg0, %c0_i32 : i32, i32
  }
  func.func @transform_1(%arg0: i32, %arg1: memref<1xi32, #tpu.memory_space<smem>>) -> (i32, i32) {
    %c0_i32 = arith.constant 0 : i32
    %c0_i32_0 = arith.constant 0 : i32
    %c0_i32_1 = arith.constant 0 : i32
    return %c0_i32, %c0_i32_0 : i32, i32
  }
  func.func @transform_2(%arg0: i32, %arg1: memref<1xi32, #tpu.memory_space<smem>>) -> (i32, i32) {
    %c0_i32 = arith.constant 0 : i32
    %c0_i32_0 = arith.constant 0 : i32
    %c0_i32_1 = arith.constant 0 : i32
    return %c0_i32, %c0_i32_0 : i32, i32
  }
  func.func @transform_3(%arg0: i32, %arg1: memref<1xi32, #tpu.memory_space<smem>>) -> (i32, i32) {
    %c0_i32 = arith.constant 0 : i32
    %c0_i32_0 = arith.constant 0 : i32
    %c0_i32_1 = arith.constant 0 : i32
    return %c0_i32, %c0_i32_0 : i32, i32
  }
  func.func @transform_4(%arg0: i32, %arg1: memref<1xi32, #tpu.memory_space<smem>>) -> (i32, i32) {
    %c0_i32 = arith.constant 0 : i32
    %c0_i32_0 = arith.constant 0 : i32
    %c0_i32_1 = arith.constant 0 : i32
    return %c0_i32, %c0_i32_0 : i32, i32
  }
  func.func @transform_5(%arg0: i32, %arg1: memref<1xi32, #tpu.memory_space<smem>>) -> (i32, i32) {
    %c0_i32 = arith.constant 0 : i32
    %c0_i32_0 = arith.constant 0 : i32
    %c0_i32_1 = arith.constant 0 : i32
    return %c0_i32, %c0_i32_0 : i32, i32
  }
  func.func @transform_6(%arg0: i32, %arg1: memref<1xi32, #tpu.memory_space<smem>>) -> (i32, i32) {
    %c0_i32 = arith.constant 0 : i32
    %c0_i32_0 = arith.constant 0 : i32
    %c0_i32_1 = arith.constant 0 : i32
    return %c0_i32, %c0_i32_0 : i32, i32
  }
  func.func @transform_7(%arg0: i32, %arg1: memref<1xi32, #tpu.memory_space<smem>>) -> (i32, i32) {
    %c0_i32 = arith.constant 0 : i32
    %c0_i32_0 = arith.constant 0 : i32
    %c0_i32_1 = arith.constant 0 : i32
    return %c0_i32, %c0_i32_0 : i32, i32
  }
  func.func @transform_8(%arg0: i32, %arg1: memref<1xi32, #tpu.memory_space<smem>>) -> (i32, i32) {
    %c0_i32 = arith.constant 0 : i32
    %c0_i32_0 = arith.constant 0 : i32
    %c0_i32_1 = arith.constant 0 : i32
    return %c0_i32, %c0_i32_0 : i32, i32
  }
  func.func @transform_9(%arg0: i32, %arg1: memref<1xi32, #tpu.memory_space<smem>>) -> (i32, i32) {
    %c0_i32 = arith.constant 0 : i32
    %c0_i32_0 = arith.constant 0 : i32
    %c0_i32_1 = arith.constant 0 : i32
    return %c0_i32, %c0_i32_0 : i32, i32
  }
  func.func @transform_10(%arg0: i32, %arg1: memref<1xi32, #tpu.memory_space<smem>>) -> (i32, i32) {
    %c0_i32 = arith.constant 0 : i32
    %c0_i32_0 = arith.constant 0 : i32
    %c0_i32_1 = arith.constant 0 : i32
    return %c0_i32, %c0_i32_0 : i32, i32
  }
  func.func @transform_11(%arg0: i32, %arg1: memref<1xi32, #tpu.memory_space<smem>>) -> (i32, i32) {
    %c0_i32 = arith.constant 0 : i32
    %c0_i32_0 = arith.constant 0 : i32
    return %arg0, %c0_i32 : i32, i32
  }
  func.func @transform_12(%arg0: i32, %arg1: memref<1xi32, #tpu.memory_space<smem>>) -> (i32, i32) {
    %c0_i32 = arith.constant 0 : i32
    %c0_i32_0 = arith.constant 0 : i32
    return %arg0, %c0_i32 : i32, i32
  }
}

</mosaic_0001>

<bundles_post_ra>
// kernel: tpu_custom_call.1
= control target key start
LH: loop header
LB: loop body
LE: loop exit
PB: predicated region body
PF: predicated region fallthrough
CT: control target
= control target key end

     0   :  { %20 = vsyncpa [#allocation5], 0  ;;  %s1228_s0 = inlined_call_operand.<no memory space> [shape: s32[1], index: 0, kind: input, shape index: {}]   ;;  %s1229_s1 = inlined_call_operand.hbm [shape: f32[8,48], index: 1, kind: input, shape index: {}]   ;;  %s1230_s2 = inlined_call_operand.hbm [shape: bf16[48,128], index: 2, kind: input, shape index: {}]   ;;  %s1231_s3 = inlined_call_operand.vmem [shape: f32[1,128], index: 3, kind: input, shape index: {}]   ;;  %s1232_s4 = inlined_call_operand.hbm [shape: bf16[128,128], index: 4, kind: input, shape index: {}]   ;;  %s1233_s5 = inlined_call_operand.vmem [shape: f32[1,128], index: 5, kind: input, shape index: {}]   ;;  %s1234_s6 = inlined_call_operand.hbm [shape: bf16[128,128], index: 6, kind: input, shape index: {}]   ;;  %s1235_s7 = inlined_call_operand.vmem [shape: f32[1,128], index: 7, kind: input, shape index: {}]   ;;  %s1236_s8 = inlined_call_operand.hbm [shape: bf16[128,128], index: 8, kind: input, shape index: {}]   ;;  %s1237_s9 = inlined_call_operand.vmem [shape: f32[1,128], index: 9, kind: input, shape index: {}]   ;;  %s1238_s10 = inlined_call_operand.hbm [shape: bf16[128,128], index: 10, kind: input, shape index: {}]   ;;  %s1239_s11 = inlined_call_operand.vmem [shape: f32[1,128], index: 11, kind: input, shape index: {}]   ;;  %s1240_s12 = inlined_call_operand.hbm [shape: f32[8,128], index: 12, kind: output, shape index: {0}]   ;;  %s1241_s13 = inlined_call_operand.hbm [shape: f32[8,128], index: 13, kind: output, shape index: {1}]  }
   0x1   :  { %21 = vsyncpa [#allocation8], 0 }
   0x2   :  { %22 = vsyncpa [#allocation11], 0 }
   0x3   :  { %23 = vsyncpa [#allocation14], 0 }
   0x4   :  { %24 = vsyncpa [#allocation6], 0  ;;  %s41_s26 = sshll.u32 %s1230_s2, 4  ;;  %s42_s26 = int_to_ptr.hbm [resolvable:$true] %s41_s26 }
   0x5   :  { %25 = vsyncpa [#allocation17], 0  ;;  %s1068_s27 = smov [#allocation7]   ;;  %s71_s30 = sshll.u32 %s1234_s6, 4  ;;  %s72_s30 = int_to_ptr.hbm [resolvable:$true] %s71_s30 }
   0x6   :  { %s43_s28 = sshll.u32 %s1068_s27, 4  ;;  %s1069_s14 = smov 64   ;;  %s44_s28 = int_to_ptr.vmem [resolvable:$true] %s43_s28 }
   0x7   :  { %s1070_s15 = smov 4   ;;  %s1071_s16 = smov [#allocation10]  }
   0x8   :  { %49 = dma.hbm_to_vmem [thread:$0]  %s42_s26, 384, %s44_s28, [#allocation8], %s1069_s14, %s1069_s14, %s1070_s15  }
   0x9   :  { %s73_s17 = sshll.u32 %s1071_s16, 4  ;;  %s31_s19 = sshll.u32 %s1229_s1, 4  ;;  %s74_s17 = int_to_ptr.vmem [resolvable:$true] %s73_s17  ;;  %s32_s19 = int_to_ptr.hbm [resolvable:$true] %s31_s19 }
   0xa   :  { %79 = dma.hbm_to_vmem [thread:$0]  %s72_s30, 1024, %s74_s17, [#allocation11], %s1069_s14, %s1069_s14, %s1070_s15  }
   0xb   :  { %s56_s21 = sshll.u32 %s1232_s4, 4  ;;  %s1072_s22 = smov [#allocation4]   ;;  %s57_s21 = int_to_ptr.hbm [resolvable:$true] %s56_s21 }
   0xc   :  { %s33_s23 = sshll.u32 %s1072_s22, 4  ;;  %s1073_s24 = smov [#allocation9]   ;;  %s34_s23 = int_to_ptr.vmem [resolvable:$true] %s33_s23 }
   0xd   :  { %36 = dma.hbm_to_vmem [thread:$0]  %s32_s19, 128, %s34_s23, [#allocation5]  }
   0xe   :  { %s58_s25 = sshll.u32 %s1073_s24, 4  ;;  %s86_s1 = sshll.u32 %s1236_s8, 4  ;;  %s59_s25 = int_to_ptr.vmem [resolvable:$true] %s58_s25  ;;  %s87_s1 = int_to_ptr.hbm [resolvable:$true] %s86_s1 }
   0xf   :  { %64 = dma.hbm_to_vmem [thread:$0]  %s57_s21, 1024, %s59_s25, [#allocation8], %s1069_s14, %s1069_s14, %s1070_s15  }
  0x10   :  { %s101_s4 = sshll.u32 %s1238_s10, 4  ;;  %s1074_s29 = smov [#allocation12]   ;;  %s102_s4 = int_to_ptr.hbm [resolvable:$true] %s101_s4 }
  0x11   :  { %s88_s30 = sshll.u32 %s1074_s29, 4  ;;  %s1075_s16 = smov [#allocation13]   ;;  %s89_s30 = int_to_ptr.vmem [resolvable:$true] %s88_s30 }
  0x12   :  { %94 = dma.hbm_to_vmem [thread:$0]  %s87_s1, 1024, %s89_s30, [#allocation11], %s1069_s14, %s1069_s14, %s1070_s15  }
  0x13   :  { %s103_s8 = sshll.u32 %s1075_s16, 4  ;;  %s104_s8 = int_to_ptr.vmem [resolvable:$true] %s103_s8 }
  0x14   :  { %109 = dma.hbm_to_vmem [thread:$0]  %s102_s4, 1024, %s104_s8, [#allocation14], %s1069_s14, %s1069_s14, %s1070_s15  }
  0x15   :  { %1056 = dma.done.wait [#allocation5], 128  }
  0x16   :  { %1057 = vsyncadd [#allocation5], 4294967168 }
  0x17   :  { %1058 = dma.done.wait [#allocation8], 1408  }
  0x18   :  { %1059 = vsyncadd [#allocation8], 4294965888 }
  0x19   :  { %1060 = dma.done.wait [#allocation11], 2048  }
  0x1a   :  { %1061 = vsyncadd [#allocation11], 4294965248 }
  0x1b   :  { %1062 = dma.done.wait [#allocation14], 1024  }
  0x1c   :  { %1063 = vsyncadd [#allocation14], 4294966272  ;;  %v807_v0 = vld [vmem:[#allocation7 + $0x10] sm:$0xff]  ;;  %v806_v2 = vld [vmem:[#allocation7 + $0x8] sm:$0xff]  ;;  %vm167_vm0 = vcmask 392192   ;;  %s628_s6 = sshll.u32 %s1240_s12, 4  ;;  %s629_s6 = int_to_ptr.hbm [resolvable:$true] %s628_s6 }
  0x1d   :  { %v815_v1 = vld [vmem:[#allocation9 + $0x38] sm:$0xff]  ;;  %176 = vmatpush.bf16.msra.mxu0 %v807_v0  ;;  %v814_v3 = vld [vmem:[#allocation9 + $0x30] sm:$0xff]  ;;  %v805_v4 = vld [vmem:[#allocation7] sm:$0xff]  ;;  %s1076_s20 = smov [#allocation15]   ;;  %s1078_s12 = smov [#allocation16]  }
  0x1e   :  { %259 = vmatpush.bf16.msra.mxu1 %v815_v1  ;;  %v137_v5 = vld [vmem:[#allocation4] sm:$0xff]  ;;  %v813_v6 = vld [vmem:[#allocation9 + $0x28] sm:$0xff]  ;;  %v811_v9 = vld [vmem:[#allocation9 + $0x18] sm:$0xff]  ;;  %s626_s21 = sshll.u32 %s1076_s20, 4  ;;  %s637_s22 = sshll.u32 %s1078_s12, 4  ;;  %s627_s21 = int_to_ptr.vmem [resolvable:$true] %s626_s21  ;;  %s638_s22 = int_to_ptr.vmem [resolvable:$true] %s637_s22 }
  0x1f   :  { %v145_v7 = vpack.c.bf16 %v137_v5, %v137_v5  ;;  %v812_v8 = vld [vmem:[#allocation9 + $0x20] sm:$0xff]  ;;  %v810_v10 = vld [vmem:[#allocation9 + $0x10] sm:$0xff]  ;;  %v809_v11 = vld [vmem:[#allocation9 + $0x8] sm:$0xff]  ;;  %s639_s25 = sshll.u32 %s1241_s13, 4  ;;  %s640_s25 = int_to_ptr.hbm [resolvable:$true] %s639_s25 }
  0x20   :  { %v808_v12 = vld [vmem:[#allocation9] sm:$0xff]  ;;  %v823_v13 = vld [vmem:[#allocation10 + $0x38] sm:$0xff]  ;;  %v822_v14 = vld [vmem:[#allocation10 + $0x30] sm:$0xff] }
  0x21   :  { %177 = vmatpush.bf16.msra.mxu0 %v806_v2  ;;  %347 = vmatpush.bf16.msra.mxu2 %v823_v13  ;;  %v821_v15 = vld [vmem:[#allocation10 + $0x28] sm:$0xff]  ;;  %v851_v16 = vld [vmem:[%s1231_s3] ss:$0 sm:$0xff]  ;;  %v819_v27 = vld [vmem:[#allocation10 + $0x18] sm:$0xff]  ;;  %v537_v13 = vlaneseq }
  0x22   :  { %260 = vmatpush.bf16.msra.mxu1 %v814_v3  ;;  %v820_v26 = vld [vmem:[#allocation10 + $0x20] sm:$0xff]  ;;  %v818_v28 = vld [vmem:[#allocation10 + $0x10] sm:$0xff]  ;;  %v817_v29 = vld [vmem:[#allocation10 + $0x8] sm:$0xff] }
  0x23   :  { %v816_v30 = vld [vmem:[#allocation10] sm:$0xff]  ;;  %v831_v31 = vld [vmem:[#allocation12 + $0x38] sm:$0xff]  ;;  %v830_v32 = vld [vmem:[#allocation12 + $0x30] sm:$0xff] }
  0x24   :  { %435 = vmatpush.bf16.msra.mxu3 %v831_v31  ;;  %v829_v33 = vld [vmem:[#allocation12 + $0x28] sm:$0xff]  ;;  %v852_v34 = vld [vmem:[%s1233_s5] ss:$0 sm:$0xff]  ;;  %v827_v45 = vld [vmem:[#allocation12 + $0x18] sm:$0xff] }
  0x25   :  { %178 = vmatpush.bf16.msra.mxu0 %v805_v4  ;;  %348 = vmatpush.bf16.msra.mxu2 %v822_v14  ;;  %v828_v44 = vld [vmem:[#allocation12 + $0x20] sm:$0xff]  ;;  %v826_v46 = vld [vmem:[#allocation12 + $0x10] sm:$0xff]  ;;  %v825_v47 = vld [vmem:[#allocation12 + $0x8] sm:$0xff]  ;;  %v1194_v14 = vand.u32 127, %v537_v13 }
  0x26   :  { %261 = vmatpush.bf16.msra.mxu1 %v813_v6  ;;  %v824_v48 = vld [vmem:[#allocation12] sm:$0xff]  ;;  %v839_v49 = vld [vmem:[#allocation13 + $0x38] sm:$0xff]  ;;  %v838_v50 = vld [vmem:[#allocation13 + $0x30] sm:$0xff] }
  0x27   :  { %v837_v51 = vld [vmem:[#allocation13 + $0x28] sm:$0xff]  ;;  %v853_v52 = vld [vmem:[%s1235_s7] ss:$0 sm:$0xff]  ;;  %v835_v63 = vld [vmem:[#allocation13 + $0x18] sm:$0xff]  ;;  %vm593_vm5 = vcmp.ge.s32.totalorder %v1194_v14, 28  ;;  %vm594_vm6 = vcmp.lt.s32.totalorder %v1194_v14, 36 }
  0x28   :  { %669 = vmatmul.msk.bf16.vlgmr.msra.gmra.mxu0 %vm167_vm0, %v145_v7  ;;  %436 = vmatpush.bf16.msra.mxu3 %v830_v32  ;;  %v836_v62 = vld [vmem:[#allocation13 + $0x20] sm:$0xff]  ;;  %v834_v0 = vld [vmem:[#allocation13 + $0x10] sm:$0xff]  ;;  %v833_v1 = vld [vmem:[#allocation13 + $0x8] sm:$0xff]  ;;  %vm540_vm8 = vcmp.lt.s32.totalorder %v1194_v14, 12  ;;  %vm566_vm9 = vcmp.ge.s32.totalorder %v1194_v14, 12  ;;  %vm567_vm10 = vcmp.lt.s32.totalorder %v1194_v14, 28 }
  0x29   :  { %349 = vmatpush.bf16.msra.mxu2 %v821_v15  ;;  %523 = vmatpush.bf16.msrb.mxu0 %v839_v49  ;;  %v832_v2 = vld [vmem:[#allocation13] sm:$0xff]  ;;  %vm1201_vm7 = vmand %vm593_vm5, %vm594_vm6 }
  0x2a   :  { %262 = vmatpush.bf16.msra.mxu1 %v812_v8  ;;  %v854_v3 = vld [vmem:[%s1237_s9] ss:$0 sm:$0xff]  ;;  %vm568_vm11 = vmand %vm566_vm9, %vm567_vm10 }
  0x2b   :  { %v855_v15 = vld [vmem:[%s1239_s11] ss:$0 sm:$0xff] }
  0x2c   :  { %437 = vmatpush.bf16.msra.mxu3 %v829_v33 }
  0x2d   :  { %350 = vmatpush.bf16.msra.mxu2 %v820_v26  ;;  %524 = vmatpush.bf16.msrb.mxu0 %v838_v50 }
  0x2e   :  { %263 = vmatpush.bf16.msra.mxu1 %v811_v9 }
  0x30   :  { %438 = vmatpush.bf16.msra.mxu3 %v828_v44 }
  0x31   :  { %351 = vmatpush.bf16.msra.mxu2 %v819_v27  ;;  %525 = vmatpush.bf16.msrb.mxu0 %v837_v51 }
  0x32   :  { %264 = vmatpush.bf16.msra.mxu1 %v810_v10 }
  0x34   :  { %439 = vmatpush.bf16.msra.mxu3 %v827_v45 }
  0x35   :  { %352 = vmatpush.bf16.msra.mxu2 %v818_v28  ;;  %526 = vmatpush.bf16.msrb.mxu0 %v836_v62 }
  0x36   :  { %265 = vmatpush.bf16.msra.mxu1 %v809_v11 }
  0x38   :  { %440 = vmatpush.bf16.msra.mxu3 %v826_v46 }
  0x39   :  { %353 = vmatpush.bf16.msra.mxu2 %v817_v29  ;;  %527 = vmatpush.bf16.msrb.mxu0 %v835_v63 }
  0x3a   :  { %266 = vmatpush.bf16.msra.mxu1 %v808_v12 }
  0x3c   :  { %441 = vmatpush.bf16.msra.mxu3 %v825_v47 }
  0x3d   :  { %354 = vmatpush.bf16.msra.mxu2 %v816_v30  ;;  %528 = vmatpush.bf16.msrb.mxu0 %v834_v0 }
  0x40   :  { %442 = vmatpush.bf16.msra.mxu3 %v824_v48 }
  0x41   :  { %529 = vmatpush.bf16.msrb.mxu0 %v833_v1 }
  0x45   :  { %530 = vmatpush.bf16.msrb.mxu0 %v832_v2 }
  0xa5   :  { %v180_v17 = vpop.f32.mrf.mxu0 }
  0xa6   :  { %v181_v18 = vadd.f32 %v851_v16, %v180_v17 }
  0xa8   :  { %v185_v19 = vmin.f32 %v181_v18, 0.0  ;;  %vm184_vm1 = vcmp.gt.f32.partialorder %v181_v18, 0.0 }
  0xaa   :  { %v186_v20 = vmul.f32 1.442695, %v185_v19 }
  0xac   :  { %856 = vpow2.f32 %v186_v20 }
  0xad   :  { %v182_v21 = vpop.f32.mrf.mxu0 }
  0xb2   :  { %v857_v22 = vpop.eup %856 }
  0xb3   :  { %v670_v23 = vadd.f32 -1.0, %v857_v22 }
  0xb5   :  { %v189_v24 = vsel %vm184_vm1, %v181_v18, %v670_v23 }
  0xb6   :  { %v207_v25 = vpack.c.bf16 %v189_v24, %v189_v24 }
  0xb8   :  { %267 = vmatmul.bf16.vlgmr.msra.gmra.mxu1 %v207_v25 }
 0x135   :  { %v268_v35 = vpop.f32.mrf.mxu1 }
 0x136   :  { %v269_v36 = vadd.f32 %v852_v34, %v268_v35 }
 0x138   :  { %v273_v37 = vmin.f32 %v269_v36, 0.0  ;;  %vm272_vm2 = vcmp.gt.f32.partialorder %v269_v36, 0.0 }
 0x13a   :  { %v274_v38 = vmul.f32 1.442695, %v273_v37 }
 0x13c   :  { %858 = vpow2.f32 %v274_v38 }
 0x13d   :  { %v270_v39 = vpop.f32.mrf.mxu1 }
 0x142   :  { %v859_v40 = vpop.eup %858 }
 0x143   :  { %v703_v41 = vadd.f32 -1.0, %v859_v40 }
 0x145   :  { %v277_v42 = vsel %vm272_vm2, %v269_v36, %v703_v41 }
 0x146   :  { %v295_v43 = vpack.c.bf16 %v277_v42, %v277_v42 }
 0x148   :  { %355 = vmatmul.bf16.vlgmr.msra.gmra.mxu2 %v295_v43 }
 0x1cb   :  { %v356_v53 = vpop.f32.mrf.mxu2 }
 0x1cc   :  { %v357_v54 = vadd.f32 %v853_v52, %v356_v53 }
 0x1ce   :  { %v361_v55 = vmin.f32 %v357_v54, 0.0  ;;  %vm360_vm3 = vcmp.gt.f32.partialorder %v357_v54, 0.0 }
 0x1d0   :  { %v362_v56 = vmul.f32 1.442695, %v361_v55 }
 0x1d2   :  { %860 = vpow2.f32 %v362_v56 }
 0x1d3   :  { %v358_v57 = vpop.f32.mrf.mxu2 }
 0x1d8   :  { %v861_v58 = vpop.eup %860 }
 0x1d9   :  { %v736_v59 = vadd.f32 -1.0, %v861_v58 }
 0x1db   :  { %v365_v60 = vsel %vm360_vm3, %v357_v54, %v736_v59 }
 0x1dc   :  { %v383_v61 = vpack.c.bf16 %v365_v60, %v365_v60 }
 0x1de   :  { %443 = vmatmul.bf16.vlgmr.msra.gmra.mxu3 %v383_v61  ;;  %v1077_v61 = vmov 0.0  }
 0x261   :  { %v444_v4 = vpop.f32.mrf.mxu3 }
 0x262   :  { %v445_v5 = vadd.f32 %v854_v3, %v444_v4 }
 0x264   :  { %v449_v6 = vmin.f32 %v445_v5, 0.0  ;;  %vm448_vm4 = vcmp.gt.f32.partialorder %v445_v5, 0.0 }
 0x266   :  { %v450_v7 = vmul.f32 1.442695, %v449_v6 }
 0x268   :  { %862 = vpow2.f32 %v450_v7 }
 0x269   :  { %v446_v8 = vpop.f32.mrf.mxu3 }
 0x26e   :  { %v863_v9 = vpop.eup %862 }
 0x26f   :  { %v769_v10 = vadd.f32 -1.0, %v863_v9 }
 0x271   :  { %v453_v11 = vsel %vm448_vm4, %v445_v5, %v769_v10 }
 0x272   :  { %v454_v12 = vpack.c.bf16 %v453_v11, %v453_v11 }
 0x274   :  { %531 = vmatmul.bf16.vlgmr.msrb.gmra.mxu0 %v454_v12 }
 0x2f1   :  { %v532_v16 = vpop.f32.mrf.mxu0 }
 0x2f2   :  { %v533_v18 = vadd.f32 %v855_v15, %v532_v16 }
 0x2f4   :  { %536 = vst [vmem:[#allocation15] sm:$0xff] %v533_v18  ;;  %v596_v19 = vsel %vm1201_vm7, %v533_v18, -1e+30  ;;  %v542_v20 = vsel %vm540_vm8, %v533_v18, -1e+30 }
 0x2f5   :  { %597 = vmax.xlane.f32.xlu1 %v596_v19  ;;  %543 = vmax.xlane.f32.xlu0 %v542_v20  ;;  %v569_v22 = vsel %vm568_vm11, %v533_v18, -1e+30  ;;  %631 = dma.vmem_to_hbm [thread:$0]  %s627_s21, 128, %s629_s6, [#allocation6]  }
 0x2f9   :  { %v534_v21 = vpop.f32.mrf.mxu0 }
 0x2fd   :  { %570 = vmax.xlane.f32.xlu0 %v569_v22 }
 0x368   :  { %v544_v23 = vpop.xlane.xlu0 %543  ;;  %v598_v26 = vpop.xlane.xlu1 %597 }
 0x369   :  { %vm545_vm12 = vcmp.eq.f32.partialorder %v542_v20, %v544_v23  ;;  %vm599_vm14 = vcmp.eq.f32.partialorder %v596_v19, %v598_v26 }
 0x36a   :  { %vm546_vm13 = vmand %vm540_vm8, %vm545_vm12 }
 0x36b   :  { %v547_v24 = vsel %vm546_vm13, %v1194_v14, 128  ;;  %vm600_vm1 = vmand %vm1201_vm7, %vm599_vm14 }
 0x36c   :  { %v549_v25 = vshra.s32 %v547_v24, 16  ;;  %v601_v32 = vsel %vm600_vm1, %v1194_v14, 128  ;;  %v548_v35 = vand.u32 65535, %v547_v24 }
 0x36d   :  { %v603_v33 = vshra.s32 %v601_v32, 16  ;;  %v602_v43 = vand.u32 65535, %v601_v32 }
 0x36e   :  { %v551_v27 = vcvt.s32.f32 %v549_v25  ;;  %v550_v37 = vcvt.s32.f32 %v548_v35 }
 0x36f   :  { %v605_v34 = vcvt.s32.f32 %v603_v33  ;;  %v604_v45 = vcvt.s32.f32 %v602_v43 }
 0x370   :  { %v571_v28 = vpop.xlane.xlu0 %570  ;;  %552 = vmin.xlane.f32.xlu1 %v551_v27 }
 0x371   :  { %vm572_vm15 = vcmp.eq.f32.partialorder %v569_v22, %v571_v28 }
 0x372   :  { %vm573_vm0 = vmand %vm568_vm11, %vm572_vm15 }
 0x373   :  { %v574_v29 = vsel %vm573_vm0, %v1194_v14, 128 }
 0x374   :  { %v576_v30 = vshra.s32 %v574_v29, 16  ;;  %v575_v39 = vand.u32 65535, %v574_v29 }
 0x376   :  { %v578_v31 = vcvt.s32.f32 %v576_v30  ;;  %v577_v41 = vcvt.s32.f32 %v575_v39 }
 0x378   :  { %579 = vmin.xlane.f32.xlu2 %v578_v31 }
 0x380   :  { %606 = vmin.xlane.f32.xlu2 %v605_v34 }
 0x3e3   :  { %v553_v36 = vpop.xlane.xlu1 %552 }
 0x3e4   :  { %vm554_vm2 = vcmp.eq.f32.partialorder %v551_v27, %v553_v36  ;;  %v559_v49 = vcvt.f32.s32 %v553_v36 }
 0x3e5   :  { %v555_v38 = vsel %vm554_vm2, %v550_v37, inf }
 0x3e6   :  { %556 = vmin.xlane.f32.xlu0 %v555_v38  ;;  %v560_v54 = vshll.u32 %v559_v49, 16 }
 0x3eb   :  { %v580_v40 = vpop.xlane.xlu2 %579 }
 0x3ec   :  { %vm581_vm3 = vcmp.eq.f32.partialorder %v578_v31, %v580_v40  ;;  %v586_v47 = vcvt.f32.s32 %v580_v40 }
 0x3ed   :  { %v582_v42 = vsel %vm581_vm3, %v577_v41, inf }
 0x3ee   :  { %583 = vmin.xlane.f32.xlu1 %v582_v42  ;;  %v587_v51 = vshll.u32 %v586_v47, 16 }
 0x3f3   :  { %v607_v44 = vpop.xlane.xlu2 %606 }
 0x3f4   :  { %vm608_vm4 = vcmp.eq.f32.partialorder %v605_v34, %v607_v44  ;;  %v613_v56 = vcvt.f32.s32 %v607_v44 }
 0x3f5   :  { %v609_v46 = vsel %vm608_vm4, %v604_v45, inf }
 0x3f6   :  { %610 = vmin.xlane.f32.xlu2 %v609_v46  ;;  %v614_v59 = vshll.u32 %v613_v56, 16 }
 0x459   :  { %v557_v48 = vpop.xlane.xlu0 %556 }
 0x45a   :  { %v558_v52 = vcvt.f32.s32 %v557_v48 }
 0x45c   :  { %v561_v57 = vadd.s32 %v560_v54, %v558_v52 }
 0x45e   :  { %vm562_vm6 = vcmp.eq.s32.totalorder %v1194_v14, %v561_v57 }
 0x45f   :  { %v802_v0 = vsel %vm562_vm6, 1.0, %v1077_v61 }
 0x461   :  { %v584_v50 = vpop.xlane.xlu1 %583 }
 0x462   :  { %v585_v53 = vcvt.f32.s32 %v584_v50 }
 0x464   :  { %v588_v55 = vadd.s32 %v587_v51, %v585_v53 }
 0x466   :  { %vm589_vm5 = vcmp.eq.s32.totalorder %v1194_v14, %v588_v55 }
 0x467   :  { %v803_v62 = vsel %vm589_vm5, 1.0, %v1077_v61 }
 0x468   :  { %v592_v1 = vadd.f32 %v803_v62, %v802_v0 }
 0x469   :  { %v611_v58 = vpop.xlane.xlu2 %610 }
 0x46a   :  { %v612_v60 = vcvt.f32.s32 %v611_v58 }
 0x46c   :  { %v615_v63 = vadd.s32 %v614_v59, %v612_v60 }
 0x46e   :  { %vm616_vm7 = vcmp.eq.s32.totalorder %v1194_v14, %v615_v63 }
 0x46f   :  { %v804_v2 = vsel %vm616_vm7, 1.0, %v1077_v61 }
 0x470   :  { %v619_v3 = vadd.f32 %v804_v2, %v592_v1 }
 0x472   :  { %620 = vst [vmem:[#allocation16] sm:$0xff] %v619_v3 }
 0x473   :  { %642 = dma.vmem_to_hbm [thread:$0]  %s638_s22, 128, %s640_s25, [#allocation17]  }
 0x474   :  { %1064 = dma.done.wait [#allocation6], 128  }
 0x475   :  { %1065 = vsyncadd [#allocation6], 4294967168 }
 0x476   :  { %1066 = dma.done.wait [#allocation17], 128  }
 0x477   :  { %1067 = vsyncadd [#allocation17], 4294967168 }
 0x478   :  { %651 = vsyncpa [#allocation5], 1 }
 0x479   :  { %652 = vsyncpa [#allocation8], 1 }
 0x47a   :  { %653 = vsyncpa [#allocation11], 1 }
 0x47b   :  { %654 = vsyncpa [#allocation14], 1 }
 0x47c   :  { %655 = vsyncpa [#allocation6], 1 }
 0x47d   :  { %656 = vsyncpa [#allocation17], 1 }

</bundles_post_ra>
